<compile_context>
chip_gen: v6e
topology: v6e:2x2x1
jax: 0.10.0
libtpu: 0.0.40
codegen_flags: <defaults>
</compile_context>

<pallas_src>
import jax
import jax.numpy as jnp
from jax.experimental import pallas as pl
from jax.experimental.pallas import tpu as pltpu


def _round_up(n, m):
    return ((n + m - 1) // m) * m


def mlp_kernel(x_ref, w1_ref, b1_ref, w2_ref, b2_ref, o_ref):
    # fc1: bf16 MXU matmul with f32 accumulation.
    h = jnp.dot(x_ref[...], w1_ref[...], preferred_element_type=jnp.float32)
    h = jnp.maximum(h + b1_ref[...], 0.0)        # bias + ReLU in f32 (VPU)
    # Dropout (eval mode) == identity.
    # fc2: cast back to bf16 for the MXU, accumulate in f32.
    y = jnp.dot(h.astype(w2_ref.dtype), w2_ref[...],
                preferred_element_type=jnp.float32)
    y = y + b2_ref[...]
    o_ref[...] = jax.nn.sigmoid(y).astype(o_ref.dtype)  # sigmoid exp -> EUP


def mlp_forward(x, w1, b1, w2, b2, *, tile_n=256):
    """x: (N, in_dim); w1: (in_dim, hidden); w2: (hidden, out).

    Weights are pre-transposed to (in, out) layout (PyTorch stores (out, in)).
    Dropout is the eval-mode identity.
    """
    N, in_dim = x.shape
    hidden = w1.shape[1]
    out_dim = w2.shape[1]
    out_dtype = x.dtype
    out_itemsize = jnp.dtype(out_dtype).itemsize

    # Lane-dense padding: feature dims -> multiples of 128, rows -> tile_n.
    in_p = _round_up(in_dim, 128)
    h_p = _round_up(hidden, 128)
    out_p = _round_up(out_dim, 128)

    tile_n = max(8, _round_up(min(tile_n, _round_up(N, 8)), 8))
    n_p = _round_up(N, tile_n)

    # Zero padding keeps the math exact: padded input/hidden columns multiply
    # zero weight rows; padded output columns are sliced off below.
    x_p = jnp.zeros((n_p, in_p), jnp.bfloat16).at[:N, :in_dim].set(
        x.astype(jnp.bfloat16))
    w1_p = jnp.zeros((in_p, h_p), jnp.bfloat16).at[:in_dim, :hidden].set(
        w1.astype(jnp.bfloat16))
    w2_p = jnp.zeros((h_p, out_p), jnp.bfloat16).at[:hidden, :out_dim].set(
        w2.astype(jnp.bfloat16))
    b1_p = jnp.zeros((1, h_p), jnp.float32).at[0, :hidden].set(
        b1.astype(jnp.float32))
    b2_p = jnp.zeros((1, out_p), jnp.float32).at[0, :out_dim].set(
        b2.astype(jnp.float32))

    grid = (n_p // tile_n,)

    # VMEM budget: double-buffered x/out tiles + resident weights/biases +
    # the live f32 intermediates; 2x headroom, capped at 64 MiB (v7x-safe).
    est = (2 * tile_n * in_p * 2                    # x tile (bf16), 2 buffers
           + 2 * tile_n * out_p * out_itemsize      # out tile, 2 buffers
           + 2 * (in_p * h_p + h_p * out_p) * 2     # weights (bf16)
           + 2 * (h_p + out_p) * 4                  # biases (f32)
           + tile_n * (h_p + out_p) * 4)            # live f32 intermediates
    vmem_limit = int(min(max(2 * est, 32 * 1024 * 1024), 64 * 1024 * 1024))

    cost = pl.CostEstimate(
        flops=2 * n_p * (in_p * h_p + h_p * out_p),
        transcendentals=n_p * out_p,                # sigmoid exp
        bytes_accessed=(x_p.size * 2 + w1_p.size * 2 + w2_p.size * 2
                        + b1_p.size * 4 + b2_p.size * 4
                        + n_p * out_p * out_itemsize),
    )

    y_padded = pl.pallas_call(
        mlp_kernel,
        out_shape=jax.ShapeDtypeStruct((n_p, out_p), out_dtype),
        grid_spec=pltpu.PrefetchScalarGridSpec(
            num_scalar_prefetch=0,
            grid=grid,
            in_specs=[
                pl.BlockSpec((tile_n, in_p), lambda i: (i, 0)),  # x row tile
                pl.BlockSpec((in_p, h_p),    lambda i: (0, 0)),  # W1 (resident)
                pl.BlockSpec((1, h_p),       lambda i: (0, 0)),  # b1 (resident)
                pl.BlockSpec((h_p, out_p),   lambda i: (0, 0)),  # W2 (resident)
                pl.BlockSpec((1, out_p),     lambda i: (0, 0)),  # b2 (resident)
            ],
            out_specs=pl.BlockSpec((tile_n, out_p), lambda i: (i, 0)),
        ),
        compiler_params=pltpu.CompilerParams(
            dimension_semantics=("parallel",),
            vmem_limit_bytes=vmem_limit),
        cost_estimate=cost,
    )(x_p, w1_p, b1_p, w2_p, b2_p)

    return y_padded[:N, :out_dim]


if __name__ == "__main__":
    # Small deterministic shapes consistent with MLP(in_dim, hidden_dim, out_dim).
    # N=512 with tile_n=256 gives a 2-step row grid (exercises the pipeline /
    # both v7x TensorCores); feature dims are padded to 128 inside the wrapper.
    N, in_dim, hidden_dim, out_dim = 512, 32, 64, 16

    key = jax.random.PRNGKey(0)
    kx, kw1, kb1, kw2, kb2 = jax.random.split(key, 5)

    x = jax.random.normal(kx, (N, in_dim), dtype=jnp.float32)

    # PyTorch-style init (uniform +-1/sqrt(fan_in)); stored transposed (in, out).
    bound1 = 1.0 / (in_dim ** 0.5)
    w1 = jax.random.uniform(kw1, (in_dim, hidden_dim), jnp.float32, -bound1, bound1)
    b1 = jax.random.uniform(kb1, (hidden_dim,), jnp.float32, -bound1, bound1)
    bound2 = 1.0 / (hidden_dim ** 0.5)
    w2 = jax.random.uniform(kw2, (hidden_dim, out_dim), jnp.float32, -bound2, bound2)
    b2 = jax.random.uniform(kb2, (out_dim,), jnp.float32, -bound2, bound2)

    out = mlp_forward(x, w1, b1, w2, b2, tile_n=256)
    out = jax.block_until_ready(out)

    # Pure-JAX f32 reference (eval-mode dropout == identity).  The kernel feeds
    # bf16 into the MXU, so tolerances are loosened accordingly (~1e-2 rel).
    ref = jax.nn.sigmoid(jnp.maximum(x @ w1 + b1, 0.0) @ w2 + b2)
    assert out.shape == (N, out_dim)
    max_err = float(jnp.max(jnp.abs(out - ref)))
    assert jnp.allclose(out, ref, atol=2e-2, rtol=2e-2), max_err

    print("KERNEL_OK")
</pallas_src>

<mosaic_0001>
module attributes {stable_mosaic.version = 11 : i64} {
  func.func @mlp_kernel(%arg0: i32, %arg1: memref<256x128xbf16, #tpu.memory_space<vmem>>, %arg2: memref<128x128xbf16, #tpu.memory_space<vmem>>, %arg3: memref<1x128xf32, #tpu.memory_space<vmem>>, %arg4: memref<128x128xbf16, #tpu.memory_space<vmem>>, %arg5: memref<1x128xf32, #tpu.memory_space<vmem>>, %arg6: memref<256x128xf32, #tpu.memory_space<vmem>>) attributes {dimension_semantics = [#tpu.dimension_semantics<parallel>], iteration_bounds = array<i64: 2>, scalar_prefetch = 0 : i64, scratch_operands = 0 : i64, tpu.core_type = #tpu.core_type<tc>, window_params = [{transform_indices = @transform_0, window_bounds = array<i64: 256, 128>}, {pipeline_mode = #tpu.pipeline_mode<synchronous>, transform_indices = @transform_1, window_bounds = array<i64: 128, 128>}, {pipeline_mode = #tpu.pipeline_mode<synchronous>, transform_indices = @transform_2, window_bounds = array<i64: 1, 128>}, {pipeline_mode = #tpu.pipeline_mode<synchronous>, transform_indices = @transform_3, window_bounds = array<i64: 128, 128>}, {pipeline_mode = #tpu.pipeline_mode<synchronous>, transform_indices = @transform_4, window_bounds = array<i64: 1, 128>}, {transform_indices = @transform_5, window_bounds = array<i64: 256, 128>}]} {
    %c0 = arith.constant 0 : index
    %c0_0 = arith.constant 0 : index
    %0 = vector.load %arg1[%c0, %c0_0] : memref<256x128xbf16, #tpu.memory_space<vmem>>, vector<256x128xbf16>
    %c0_1 = arith.constant 0 : index
    %c0_2 = arith.constant 0 : index
    %1 = vector.load %arg2[%c0_1, %c0_2] : memref<128x128xbf16, #tpu.memory_space<vmem>>, vector<128x128xbf16>
    %cst = arith.constant dense<0.000000e+00> : vector<256x128xf32>
    %2 = tpu.matmul %0, %1, %cst {dimension_numbers = #tpu.dot_dimension_numbers<[1], [0], [0], [1], [0, 0, 1, 1], [], []>} : vector<256x128xbf16>, vector<128x128xbf16>, vector<256x128xf32> -> vector<256x128xf32>
    %c0_3 = arith.constant 0 : index
    %c0_4 = arith.constant 0 : index
    %3 = vector.load %arg3[%c0_3, %c0_4] : memref<1x128xf32, #tpu.memory_space<vmem>>, vector<1x128xf32>
    %4 = vector.broadcast %3 : vector<1x128xf32> to vector<256x128xf32>
    %5 = arith.addf %2, %4 : vector<256x128xf32>
    %cst_5 = arith.constant 0.000000e+00 : f32
    %6 = vector.broadcast %cst_5 : f32 to vector<256x128xf32>
    %7 = arith.maximumf %5, %6 : vector<256x128xf32>
    %8 = arith.truncf %7 : vector<256x128xf32> to vector<256x128xbf16>
    %c0_6 = arith.constant 0 : index
    %c0_7 = arith.constant 0 : index
    %9 = vector.load %arg4[%c0_6, %c0_7] : memref<128x128xbf16, #tpu.memory_space<vmem>>, vector<128x128xbf16>
    %cst_8 = arith.constant dense<0.000000e+00> : vector<256x128xf32>
    %10 = tpu.matmul %8, %9, %cst_8 {dimension_numbers = #tpu.dot_dimension_numbers<[1], [0], [0], [1], [0, 0, 1, 1], [], []>} : vector<256x128xbf16>, vector<128x128xbf16>, vector<256x128xf32> -> vector<256x128xf32>
    %c0_9 = arith.constant 0 : index
    %c0_10 = arith.constant 0 : index
    %11 = vector.load %arg5[%c0_9, %c0_10] : memref<1x128xf32, #tpu.memory_space<vmem>>, vector<1x128xf32>
    %12 = vector.broadcast %11 : vector<1x128xf32> to vector<256x128xf32>
    %13 = arith.addf %10, %12 : vector<256x128xf32>
    %14 = arith.negf %13 : vector<256x128xf32>
    %15 = math.exp %14 : vector<256x128xf32>
    %cst_11 = arith.constant 1.000000e+00 : f32
    %16 = vector.broadcast %cst_11 : f32 to vector<256x128xf32>
    %17 = arith.addf %16, %15 : vector<256x128xf32>
    %18 = arith.divf %16, %17 : vector<256x128xf32>
    %c0_12 = arith.constant 0 : index
    %c0_13 = arith.constant 0 : index
    %19 = vector.load %arg6[%c0_12, %c0_13] : memref<256x128xf32, #tpu.memory_space<vmem>>, vector<256x128xf32>
    tpu.vector_store %arg6[%c0_12, %c0_13], %18 {strides = array<i32>} : memref<256x128xf32, #tpu.memory_space<vmem>>, vector<256x128xf32>,
    return
  }
  func.func @transform_0(%arg0: i32) -> (i32, i32) {
    %c0_i32 = arith.constant 0 : i32
    %c0_i32_0 = arith.constant 0 : i32
    return %arg0, %c0_i32 : i32, i32
  }
  func.func @transform_1(%arg0: i32) -> (i32, i32) {
    %c0_i32 = arith.constant 0 : i32
    %c0_i32_0 = arith.constant 0 : i32
    %c0_i32_1 = arith.constant 0 : i32
    return %c0_i32, %c0_i32_0 : i32, i32
  }
  func.func @transform_2(%arg0: i32) -> (i32, i32) {
    %c0_i32 = arith.constant 0 : i32
    %c0_i32_0 = arith.constant 0 : i32
    %c0_i32_1 = arith.constant 0 : i32
    return %c0_i32, %c0_i32_0 : i32, i32
  }
  func.func @transform_3(%arg0: i32) -> (i32, i32) {
    %c0_i32 = arith.constant 0 : i32
    %c0_i32_0 = arith.constant 0 : i32
    %c0_i32_1 = arith.constant 0 : i32
    return %c0_i32, %c0_i32_0 : i32, i32
  }
  func.func @transform_4(%arg0: i32) -> (i32, i32) {
    %c0_i32 = arith.constant 0 : i32
    %c0_i32_0 = arith.constant 0 : i32
    %c0_i32_1 = arith.constant 0 : i32
    return %c0_i32, %c0_i32_0 : i32, i32
  }
  func.func @transform_5(%arg0: i32) -> (i32, i32) {
    %c0_i32 = arith.constant 0 : i32
    %c0_i32_0 = arith.constant 0 : i32
    return %arg0, %c0_i32 : i32, i32
  }
}

</mosaic_0001>

<bundles_post_ra>
// kernel: tpu_custom_call.1
= control target key start
LH: loop header
LB: loop body
LE: loop exit
PB: predicated region body
PF: predicated region fallthrough
CT: control target
= control target key end

     0   :  { %10 = vsyncpa [#allocation3], 0  ;;  %s2219_s0 = inlined_call_operand.hbm [shape: bf16[512,128], index: 0, kind: input, shape index: {}]   ;;  %s2220_s1 = inlined_call_operand.hbm [shape: bf16[128,128], index: 1, kind: input, shape index: {}]   ;;  %s2221_s2 = inlined_call_operand.vmem [shape: f32[1,128], index: 2, kind: input, shape index: {}]   ;;  %s2222_s3 = inlined_call_operand.hbm [shape: bf16[128,128], index: 3, kind: input, shape index: {}]   ;;  %s2223_s4 = inlined_call_operand.vmem [shape: f32[1,128], index: 4, kind: input, shape index: {}]   ;;  %s2224_s5 = inlined_call_operand.hbm [shape: f32[512,128], index: 5, kind: output, shape index: {}]  }
   0x1   :  { %12 = vsyncpa [#allocation3 + $0x1], 0 }
   0x2   :  { %13 = vsyncpa [#allocation6], 0 }
   0x3   :  { %14 = vsyncpa [#allocation4], 0 }
   0x4   :  { %16 = vsyncpa [#allocation4 + $0x1], 0  ;;  %s1894_s18 = smov 0   ;;  %s1896_s19 = smov 0  }
   0x5   :  { %s1898_s20 = smov 0   ;;  %s1900_s21 = smov 0  }
   0x6 LB: > { %s1915_s22 = sadd.s32 4294967295, %s1854_s21   ;;  %s1245_s23 = sadd.s32 4294967294, %s1854_s21   ;;  %s1854_s21 = sphi %s1900_s21, %s2247_s21   ;;  %s1850_s20 = sphi %s1898_s20, %s2246_s20   ;;  %s1846_s19 = sphi %s1896_s19, %s2245_s19   ;;  %s1842_s18 = sphi %s1894_s18, %s2244_s18  }
   0x7   : > { %p42_p0 = scmp.ne.s32.totalorder %s1846_s19, %s1842_s18  ;;  %p2225_p1 = scmp.eq.s32.totalorder %s1915_s22, 0 }
   0x8   : > { %p150_p2 = scmp.eq.s32.totalorder %s1915_s22, 1  ;;  %p156_p3 = scmp.eq.s32.totalorder %s1245_s23, 1 }
   0x9   : > { %p1924_p4 = por %p2225_p1, %p42_p0  ;;  %p1246_p5 = scmp.ge.s32.totalorder %s1854_s21, 1 }
   0xa   : > { %p1929_p6 = por %p156_p3, %p42_p0  ;;  %p163_p7 = scmp.lt.s32.totalorder %s1854_s21, 3 }
   0xb   : > { %s2230_s24 = scalar_select %p1924_p4, 1, 0 }
   0xc   : > { %s2231_s25 = scalar_select %p1929_p6, 1, 0 }
   0xd   : > { %p1934_p8 = pnand %p1246_p5, %p163_p7  ;;  %s1856_s27 = smov [#allocation5]  }
   0xe   : > { %s175_s28 = sshll.u32 %s1856_s27, 4  ;;  %s1857_s30 = smov [#allocation7]   ;;  %s176_s28 = int_to_ptr.vmem [resolvable:$true] %s175_s28 }
   0xf   : > { %s2232_s26 = scalar_select %p1934_p8, 1, 0 }
  0x10   : > { %p1487_p9 = pneg %p1934_p8  ;;  %s191_s6 = sshll.u32 %s1857_s30, 4  ;;  %s192_s6 = int_to_ptr.vmem [resolvable:$true] %s191_s6 }
  0x11   : > { %s1717_s7 = scalar_lea.vmem %s176_s28, 1024  ;;  %p1725_p5 = scmp.lt.s32.totalorder %s176_s28, %s176_s28 }
  0x12   : > { %p1943_p11 = pnand %p1487_p9, %p2225_p1  ;;  %p1718_p13 = scmp.ne.s32.totalorder %s176_s28, %s1717_s7 }
  0x13   : > { %p1726_p7 = scmp.lt.s32.totalorder %s1717_s7, %s1717_s7 }
  0x14   : > { %p1708_p12 = pneg %p1943_p11 }
  0x15   : > { %p1727_p10 = por %p1726_p7, %p1725_p5 }
  0x16   : > { %p1720_p0 = pnand %p1718_p13, %p1708_p12 }
  0x18   : > { %p1721_p3 = pneg %p1720_p0 }
  0x1a   : > { %p1728_p9 = pnand %p1727_p10, %p1721_p3 }
  0x1c   : > { %1731 = shalt.err (!%p1728_p9)
}
  0x1d   : > { %s2226_s8 = smov 64   ;;  %s1859_s9 = smov 4  }
  0x1e   : > { %1490 = dma.hbm_to_vmem [thread:$0]  (!%p1943_p11), %s2220_s1, 1024, %s176_s28, [#allocation6], %s2226_s8, %s2226_s8, %s1859_s9  }
  0x1f   : > { %s1743_s12 = scalar_lea.vmem %s192_s6, 1024  ;;  %p1751_p10 = scmp.lt.s32.totalorder %s192_s6, %s192_s6 }
  0x20   : > { %p1744_p13 = scmp.ne.s32.totalorder %s192_s6, %s1743_s12  ;;  %p1752_p3 = scmp.lt.s32.totalorder %s1743_s12, %s1743_s12 }
  0x22   : > { %p1746_p0 = pnand %p1744_p13, %p1708_p12  ;;  %p1753_p7 = por %p1752_p3, %p1751_p10 }
  0x24   : > { %p1747_p5 = pneg %p1746_p0 }
  0x26   : > { %p1754_p9 = pnand %p1753_p7, %p1747_p5 }
  0x28   : > { %1757 = shalt.err (!%p1754_p9)
}
  0x29   : > { %1493 = dma.hbm_to_vmem [thread:$0]  (!%p1943_p11), %s2222_s3, 1024, %s192_s6, [#allocation6], %s2226_s8, %s2226_s8, %s1859_s9  }
  0x2a   : > { %s1972_s15 = sadd.s32 1, %s1854_s21   ;;  %s29_s16 = sadd.s32 1, %s1850_s20 }
  0x2b   : > { %s26_s17 = ssub.s32 %s1854_s21, %s1972_s15  ;;  %p36_p12 = scmp.ne.s32.totalorder %s1850_s20, %s1846_s19 }
  0x2c   : > { %p27_p13 = scmp.eq.s32.totalorder %s26_s17, 0  ;;  %p37_p0 = scmp.eq.s32.totalorder %s1854_s21, 0 }
  0x2d   : > { %p1982_p5 = por %p150_p2, %p36_p12  ;;  %p1504_p10 = scmp.lt.s32.totalorder %s1854_s21, 2 }
  0x2e   : > { %s1988_s27 = scalar_select %p27_p13, %s1850_s20, %s29_s16  }
  0x2f   : > { %s2234_s23 = scalar_select %p1982_p5, 1, 0 }
  0x30   : > { %p38_p3 = por %p37_p0, %p36_p12  ;;  %s208_s28 = sand.u32 1, %s1850_s20  }
  0x31   : > { %s1250_s29 = sshll.u32 %s208_s28, 7  ;;  %s1329_s30 = sshll.u32 %s1854_s21, 11 }
  0x32   : > { %s1995_s10 = scalar_lea.hbm %s2219_s0, %s1329_s30  ;;  %s212_s11 = scalar_lea.vmem [#allocation2], %s1250_s29 }
  0x33   : > { %s219_s12 = sshll.u32 %s212_s11, 4  ;;  %p1999_p2 = pnand %p1504_p10, %p38_p3  ;;  %s1997_s12 = int_to_ptr.vmem [resolvable:$true] %s219_s12 }
  0x34   : > { %s2003_s14 = scalar_lea.sflag [#allocation3], %s208_s28  ;;  %s1758_s16 = scalar_lea.hbm %s1995_s10, 2048 }
  0x35   : > { %p1759_p11 = scmp.ne.s32.totalorder %s1995_s10, %s1758_s16  ;;  %p1760_p7 = pneg %p1999_p2 }
  0x36   : > { %s1763_s29 = scalar_lea.hbm %s2219_s0, 4096  ;;  %p1764_p13 = scmp.lt.s32.totalorder %s1995_s10, %s2219_s0 }
  0x37   : > { %p1761_p9 = pnand %p1760_p7, %p1759_p11  ;;  %p1765_p0 = scmp.lt.s32.totalorder %s1763_s29, %s1758_s16 }
  0x39   : > { %p1762_p12 = pneg %p1761_p9  ;;  %p1766_p10 = por %p1765_p0, %p1764_p13 }
  0x3b   : > { %p1767_p3 = pnand %p1766_p10, %p1762_p12 }
  0x3d   : > { %1770 = shalt.err (!%p1767_p3)
}
  0x3e   : > { %s1771_s28 = scalar_lea.vmem %s1997_s12, 2048  ;;  %s1860_s11 = smov [#allocation2]  }
  0x3f   : > { %p1772_p1 = scmp.ne.s32.totalorder %s1997_s12, %s1771_s28  ;;  %s1776_s8 = sshll.u32 %s1860_s11, 4  ;;  %s1777_s8 = int_to_ptr.vmem [resolvable:$false] %s1776_s8 }
  0x40   : > { %s1778_s17 = scalar_lea.vmem %s1777_s8, 4096  ;;  %p1779_p9 = scmp.lt.s32.totalorder %s1997_s12, %s1777_s8 }
  0x41   : > { %p1774_p6 = pnand %p1772_p1, %p1760_p7  ;;  %p1780_p5 = scmp.lt.s32.totalorder %s1778_s17, %s1771_s28 }
  0x43   : > { %p1775_p11 = pneg %p1774_p6  ;;  %p1781_p4 = por %p1780_p5, %p1779_p9 }
  0x45   : > { %p1782_p8 = pnand %p1781_p4, %p1775_p11 }
  0x47   : > { %1785 = shalt.err (!%p1782_p8)
}
  0x48   : > { %s2236_s16 = smov 64   ;;  %p2237_p1 = scmp.ne.s32.totalorder %s2232_s26, 0 }
  0x49   : > { %1497 = dma.hbm_to_vmem [thread:$0]  (!%p1999_p2), %s1995_s10, 2048, %s1997_s12, %s2003_s14, %s2236_s16, %s2236_s16, %s1859_s9  }
  0x4a   : > { %231 = sbr.rel (%p2237_p1) target bundleno = 626 (0x272), region = 40  ;;  %s2030_s30 = sand.u32 (!%p2237_p1), 1, %s1846_s19  }
  0x4b   : > { %s1254_s8 = sshll.u32 (!%p2237_p1), %s2030_s30, 7  ;;  %s234_s29 = scalar_lea.sflag (!%p2237_p1), [#allocation3], %s2030_s30 }
  0x4c   : > { %s2034_s6 = scalar_lea.vmem (!%p2237_p1), [#allocation2], %s1254_s8  ;;  %p2238_p4 = scmp.ne.s32.totalorder (!%p2237_p1), %s2230_s24, 0 }
  0x4f   : > { %1829 = dma.done.wait (%p2238_p4), %s234_s29, 2048  }
  0x50   : > { %1831 = vsyncadd (%p2238_p4), %s234_s29, 4294965248  ;;  %p2239_p6 = scmp.eq.s32.totalorder %s1915_s22, 0 }
  0x52   : > { %1833 = dma.done.wait (%p2239_p6), [#allocation6], 2048   ;;  %p2240_p8 = pmov %p2239_p6 }
  0x53   : > { %v1546_v0 = vld [vmem:[#allocation5 + $0x38] sm:$0xff]   ;;  %v1547_v1 = vld [vmem:[#allocation5 + $0x30] sm:$0xff]   ;;  %v1548_v2 = vld [vmem:[#allocation5 + $0x28] sm:$0xff]   ;;  %s1257_s12 = sshll.u32 %s2030_s30, 8  ;;  %s1330_s14 = sshll.u32 %s1915_s22, 12 }
  0x54   : > { %1835 = vsyncadd (%p2240_p8), [#allocation6], 4294965248  ;;  %1379 = vmatprep.subr.bf16.mxu0 %v1546_v0  ;;  %v1549_v3 = vld [vmem:[#allocation5 + $0x20] sm:$0xff]   ;;  %v1550_v5 = vld [vmem:[#allocation5 + $0x18] sm:$0xff]   ;;  %s2120_s13 = scalar_lea.vmem [#allocation8], %s1257_s12  ;;  %s2172_s17 = scalar_lea.hbm %s2224_s5, %s1330_s14 }
  0x55   : > { %1380 = vmatpush3.bf16.msra.mxu0 %v1546_v0  ;;  %v1554_v4 = vld [vmem:[%s2034_s6] sm:$0xff]   ;;  %v1551_v6 = vld [vmem:[#allocation5 + $0x10] sm:$0xff]   ;;  %v1552_v7 = vld [vmem:[#allocation5 + $0x8] sm:$0xff]   ;;  %s1153_s7 = sshll.u32 %s2120_s13, 4  ;;  %s1140_s16 = scalar_lea.sflag [#allocation4], %s2030_s30  ;;  %s2174_s7 = int_to_ptr.vmem [resolvable:$true] %s1153_s7 }
  0x56   : > { %1381 = vmatprep.subr.bf16.mxu0 %v1547_v1  ;;  %1395 = vmatprep.mubr.bf16.mxu0 %v1554_v4  ;;  %v1553_v8 = vld [vmem:[#allocation5] sm:$0xff]   ;;  %v1570_v9 = vld [vmem:[#allocation7 + $0x38] sm:$0xff]   ;;  %v1571_v10 = vld [vmem:[#allocation7 + $0x30] sm:$0xff]   ;;  %s1786_s8 = scalar_lea.vmem %s2174_s7, 4096  ;;  %p2241_p2 = scmp.ne.s32.totalorder %s2234_s23, 0 }
  0x57   : > { %1427 = vmatprep.subr.bf16.mxu1 %v1570_v9  ;;  %v1555_v11 = vld [vmem:[%s2034_s6 + $0x8] sm:$0xff]   ;;  %v1556_v13 = vld [vmem:[%s2034_s6 + $0x10] sm:$0xff]   ;;  %v1573_v14 = vld [vmem:[#allocation7 + $0x20] sm:$0xff]   ;;  %p1787_p5 = scmp.ne.s32.totalorder %s2174_s7, %s1786_s8  ;;  %s1861_s22 = smov [#allocation8]  }
  0x58   : > { %1428 = vmatpush3.bf16.msra.mxu1 %v1570_v9  ;;  %v1572_v12 = vld [vmem:[#allocation7 + $0x28] sm:$0xff]   ;;  %v1574_v15 = vld [vmem:[#allocation7 + $0x18] sm:$0xff]   ;;  %v1558_v17 = vld [vmem:[%s2034_s6 + $0x20] sm:$0xff]   ;;  %s1790_s29 = sshll.u32 %s1861_s22, 4  ;;  %s1791_s29 = int_to_ptr.vmem [resolvable:$false] %s1790_s29 }
  0x59   : > { %1382 = vmatpush3.bf16.msra.mxu0 %v1547_v1  ;;  %1429 = vmatprep.subr.bf16.mxu1 %v1571_v10  ;;  %v1557_v16 = vld [vmem:[%s2034_s6 + $0x18] sm:$0xff]   ;;  %v1559_v18 = vld [vmem:[%s2034_s6 + $0x28] sm:$0xff]   ;;  %v1560_v19 = vld [vmem:[%s2034_s6 + $0x30] sm:$0xff]   ;;  %p1788_p7 = pnand %p1787_p5, %p2241_p2  ;;  %p1793_p13 = scmp.lt.s32.totalorder %s2174_s7, %s1791_s29 }
  0x5a   : > { %1383 = vmatprep.subr.bf16.mxu0 %v1548_v2  ;;  %v1561_v20 = vld [vmem:[%s2034_s6 + $0x38] sm:$0xff]   ;;  %v1562_v21 = vld [vmem:[%s2034_s6 + $0x40] sm:$0xff]   ;;  %v1563_v22 = vld [vmem:[%s2034_s6 + $0x48] sm:$0xff]  }
  0x5b   : > { %v1564_v23 = vld [vmem:[%s2034_s6 + $0x50] sm:$0xff]   ;;  %v1565_v24 = vld [vmem:[%s2034_s6 + $0x58] sm:$0xff]   ;;  %v1566_v25 = vld [vmem:[%s2034_s6 + $0x60] sm:$0xff]   ;;  %p1789_p12 = pneg %p1788_p7 }
  0x5c   : > { %1430 = vmatpush3.bf16.msra.mxu1 %v1571_v10  ;;  %v1567_v26 = vld [vmem:[%s2034_s6 + $0x68] sm:$0xff]   ;;  %v1568_v27 = vld [vmem:[%s2034_s6 + $0x70] sm:$0xff]   ;;  %v1569_v28 = vld [vmem:[%s2034_s6 + $0x78] sm:$0xff]   ;;  %s1792_s6 = scalar_lea.vmem %s1791_s29, 8192 }
  0x5d   : > { %1384 = vmatpush3.bf16.msra.mxu0 %v1548_v2  ;;  %1431 = vmatprep.subr.bf16.mxu1 %v1572_v12  ;;  %v1575_v29 = vld [vmem:[#allocation7 + $0x10] sm:$0xff]   ;;  %v1576_v30 = vld [vmem:[#allocation7 + $0x8] sm:$0xff]   ;;  %v1577_v31 = vld [vmem:[#allocation7] sm:$0xff]   ;;  %p1794_p0 = scmp.lt.s32.totalorder %s1792_s6, %s1786_s8 }
  0x5e   : > { %1385 = vmatprep.subr.bf16.mxu0 %v1549_v3  ;;  %v2063_v34 = vld [vmem:[%s2221_s2] ss:$0 sm:$0xff] }
  0x5f   : > { %p1795_p10 = por %p1794_p0, %p1793_p13 }
  0x60   : > { %1432 = vmatpush3.bf16.msra.mxu1 %v1572_v12 }
  0x61   : > { %1386 = vmatpush3.bf16.msra.mxu0 %v1549_v3  ;;  %1433 = vmatprep.subr.bf16.mxu1 %v1573_v14  ;;  %p1796_p3 = pnand %p1795_p10, %p1789_p12 }
  0x62   : > { %1387 = vmatprep.subr.bf16.mxu0 %v1550_v5 }
  0x64   : > { %1434 = vmatpush3.bf16.msra.mxu1 %v1573_v14 }
  0x65   : > { %1388 = vmatpush3.bf16.msra.mxu0 %v1550_v5  ;;  %1435 = vmatprep.subr.bf16.mxu1 %v1574_v15 }
  0x66   : > { %1389 = vmatprep.subr.bf16.mxu0 %v1551_v6 }
  0x68   : > { %1436 = vmatpush3.bf16.msra.mxu1 %v1574_v15 }
  0x69   : > { %1390 = vmatpush3.bf16.msra.mxu0 %v1551_v6  ;;  %1437 = vmatprep.subr.bf16.mxu1 %v1575_v29 }
  0x6a   : > { %1391 = vmatprep.subr.bf16.mxu0 %v1552_v7 }
  0x6c   : > { %1438 = vmatpush3.bf16.msra.mxu1 %v1575_v29 }
  0x6d   : > { %1392 = vmatpush3.bf16.msra.mxu0 %v1552_v7  ;;  %1439 = vmatprep.subr.bf16.mxu1 %v1576_v30 }
  0x6e   : > { %1393 = vmatprep.subr.bf16.mxu0 %v1553_v8 }
  0x70   : > { %1440 = vmatpush3.bf16.msra.mxu1 %v1576_v30 }
  0x71   : > { %1394 = vmatpush3.bf16.msra.mxu0 %v1553_v8  ;;  %1441 = vmatprep.subr.bf16.mxu1 %v1577_v31 }
  0x74   : > { %1396 = vmatmul.mubr.bf16.vlgmr.msra.gmra.mxu0 %v1555_v11  ;;  %1442 = vmatpush3.bf16.msra.mxu1 %v1577_v31 }
  0x75   : > { %1399 = vmatprep.mubr.bf16.mxu0 %v1556_v13 }
  0x7c   : > { %1400 = vmatmul.mubr.bf16.gmra.mxu0 %v1557_v16 }
  0x7d   : > { %1403 = vmatprep.mubr.bf16.mxu0 %v1558_v17 }
  0x84   : > { %1404 = vmatmul.mubr.bf16.gmra.mxu0 %v1559_v18 }
  0x85   : > { %1407 = vmatprep.mubr.bf16.mxu0 %v1560_v19 }
  0x8c   : > { %1408 = vmatmul.mubr.bf16.gmra.mxu0 %v1561_v20 }
  0x8d   : > { %1411 = vmatprep.mubr.bf16.mxu0 %v1562_v21 }
  0x94   : > { %1412 = vmatmul.mubr.bf16.gmra.mxu0 %v1563_v22 }
  0x95   : > { %1415 = vmatprep.mubr.bf16.mxu0 %v1564_v23 }
  0x9c   : > { %1416 = vmatmul.mubr.bf16.gmra.mxu0 %v1565_v24 }
  0x9d   : > { %1419 = vmatprep.mubr.bf16.mxu0 %v1566_v25 }
  0xa4   : > { %1420 = vmatmul.mubr.bf16.gmra.mxu0 %v1567_v26 }
  0xa5   : > { %1423 = vmatprep.mubr.bf16.mxu0 %v1568_v27 }
  0xac   : > { %1424 = vmatmul.mubr.bf16.gmra.mxu0 %v1569_v28 }
 0x134   : > { %v1397_v32 = vpop.f32.mrf.mxu0 }
 0x135   : > { %v517_v38 = vadd.f32 %v1397_v32, %v2063_v34 }
 0x136   : > { %v508_v33 = vpop.f32.mrf.mxu0 }
 0x137   : > { %v509_v36 = vadd.f32 %v2063_v34, %v508_v33  ;;  %v637_v45 = vmax.f32 %v517_v38, 0.0 }
 0x138   : > { %v1398_v35 = vpop.f32.mrf.mxu0 }
 0x139   : > { %v520_v37 = vadd.f32 %v1398_v35, %v2063_v34  ;;  %v635_v43 = vmax.f32 %v509_v36, 0.0 }
 0x13a   : > { %v511_v39 = vpop.f32.mrf.mxu0 }
 0x13b   : > { %v512_v40 = vadd.f32 %v2063_v34, %v511_v39  ;;  %v638_v41 = vmax.f32 %v520_v37, 0.0 }
 0x13c   : > { %v1401_v42 = vpop.f32.mrf.mxu0 }
 0x13d   : > { %v636_v44 = vmax.f32 %v512_v40, 0.0  ;;  %v668_v48 = vpack.c.bf16 %v638_v41, %v637_v45  ;;  %v533_v52 = vadd.f32 %v1401_v42, %v2063_v34 }
 0x13e   : > { %v524_v46 = vpop.f32.mrf.mxu0 }
 0x13f   : > { %v667_v47 = vpack.c.bf16 %v636_v44, %v635_v43  ;;  %v525_v50 = vadd.f32 %v2063_v34, %v524_v46  ;;  %v641_v59 = vmax.f32 %v533_v52, 0.0 }
 0x140   : > { %v1402_v49 = vpop.f32.mrf.mxu0 }
 0x141   : > { %v536_v51 = vadd.f32 %v1402_v49, %v2063_v34  ;;  %1443 = vmatprep.mubr.bf16.mxu1 %v667_v47  ;;  %v639_v57 = vmax.f32 %v525_v50, 0.0 }
 0x142   : > { %v527_v53 = vpop.f32.mrf.mxu0  ;;  %1444 = vmatmul.mubr.bf16.vlgmr.msra.gmra.mxu1 %v668_v48 }
 0x143   : > { %v528_v54 = vadd.f32 %v2063_v34, %v527_v53  ;;  %v642_v55 = vmax.f32 %v536_v51, 0.0 }
 0x144   : > { %v1405_v56 = vpop.f32.mrf.mxu0 }
 0x145   : > { %v640_v58 = vmax.f32 %v528_v54, 0.0  ;;  %v670_v62 = vpack.c.bf16 %v642_v55, %v641_v59  ;;  %v549_v2 = vadd.f32 %v1405_v56, %v2063_v34 }
 0x146   : > { %v540_v60 = vpop.f32.mrf.mxu0 }
 0x147   : > { %v669_v61 = vpack.c.bf16 %v640_v58, %v639_v57  ;;  %v541_v0 = vadd.f32 %v2063_v34, %v540_v60  ;;  %v645_v9 = vmax.f32 %v549_v2, 0.0 }
 0x148   : > { %v1406_v63 = vpop.f32.mrf.mxu0 }
 0x149   : > { %v552_v1 = vadd.f32 %v1406_v63, %v2063_v34  ;;  %1447 = vmatprep.mubr.bf16.mxu1 %v669_v61  ;;  %v643_v7 = vmax.f32 %v541_v0, 0.0 }
 0x14a   : > { %v543_v3 = vpop.f32.mrf.mxu0  ;;  %1448 = vmatmul.mubr.bf16.gmra.mxu1 %v670_v62 }
 0x14b   : > { %v544_v4 = vadd.f32 %v2063_v34, %v543_v3  ;;  %v646_v5 = vmax.f32 %v552_v1, 0.0 }
 0x14c   : > { %v1409_v6 = vpop.f32.mrf.mxu0 }
 0x14d   : > { %v644_v8 = vmax.f32 %v544_v4, 0.0  ;;  %v672_v12 = vpack.c.bf16 %v646_v5, %v645_v9  ;;  %v565_v16 = vadd.f32 %v1409_v6, %v2063_v34 }
 0x14e   : > { %v556_v10 = vpop.f32.mrf.mxu0 }
 0x14f   : > { %v671_v11 = vpack.c.bf16 %v644_v8, %v643_v7  ;;  %v557_v14 = vadd.f32 %v2063_v34, %v556_v10  ;;  %v649_v23 = vmax.f32 %v565_v16, 0.0 }
 0x150   : > { %v1410_v13 = vpop.f32.mrf.mxu0 }
 0x151   : > { %v568_v15 = vadd.f32 %v1410_v13, %v2063_v34  ;;  %1451 = vmatprep.mubr.bf16.mxu1 %v671_v11  ;;  %v647_v21 = vmax.f32 %v557_v14, 0.0 }
 0x152   : > { %v559_v17 = vpop.f32.mrf.mxu0  ;;  %1452 = vmatmul.mubr.bf16.gmra.mxu1 %v672_v12 }
 0x153   : > { %v560_v18 = vadd.f32 %v2063_v34, %v559_v17  ;;  %v650_v19 = vmax.f32 %v568_v15, 0.0 }
 0x154   : > { %v1413_v20 = vpop.f32.mrf.mxu0 }
 0x155   : > { %v648_v22 = vmax.f32 %v560_v18, 0.0  ;;  %v674_v26 = vpack.c.bf16 %v650_v19, %v649_v23  ;;  %v581_v30 = vadd.f32 %v1413_v20, %v2063_v34  ;;  %v2100_v18 = vld [vmem:[%s2223_s4] ss:$0 sm:$0xff] }
 0x156   : > { %v572_v24 = vpop.f32.mrf.mxu0 }
 0x157   : > { %v673_v25 = vpack.c.bf16 %v648_v22, %v647_v21  ;;  %v573_v28 = vadd.f32 %v2063_v34, %v572_v24  ;;  %v653_v38 = vmax.f32 %v581_v30, 0.0 }
 0x158   : > { %v1414_v27 = vpop.f32.mrf.mxu0 }
 0x159   : > { %v584_v29 = vadd.f32 %v1414_v27, %v2063_v34  ;;  %1455 = vmatprep.mubr.bf16.mxu1 %v673_v25  ;;  %v651_v36 = vmax.f32 %v573_v28, 0.0 }
 0x15a   : > { %v575_v31 = vpop.f32.mrf.mxu0  ;;  %1456 = vmatmul.mubr.bf16.gmra.mxu1 %v674_v26 }
 0x15b   : > { %v576_v32 = vadd.f32 %v2063_v34, %v575_v31  ;;  %v654_v33 = vmax.f32 %v584_v29, 0.0 }
 0x15c   : > { %v1417_v35 = vpop.f32.mrf.mxu0 }
 0x15d   : > { %v652_v37 = vmax.f32 %v576_v32, 0.0  ;;  %v676_v41 = vpack.c.bf16 %v654_v33, %v653_v38  ;;  %v597_v45 = vadd.f32 %v1417_v35, %v2063_v34 }
 0x15e   : > { %v588_v39 = vpop.f32.mrf.mxu0 }
 0x15f   : > { %v675_v40 = vpack.c.bf16 %v652_v37, %v651_v36  ;;  %v589_v43 = vadd.f32 %v2063_v34, %v588_v39  ;;  %v657_v52 = vmax.f32 %v597_v45, 0.0 }
 0x160   : > { %v1418_v42 = vpop.f32.mrf.mxu0 }
 0x161   : > { %v600_v44 = vadd.f32 %v1418_v42, %v2063_v34  ;;  %1459 = vmatprep.mubr.bf16.mxu1 %v675_v40  ;;  %v655_v50 = vmax.f32 %v589_v43, 0.0 }
 0x162   : > { %v591_v46 = vpop.f32.mrf.mxu0  ;;  %1460 = vmatmul.mubr.bf16.gmra.mxu1 %v676_v41 }
 0x163   : > { %v592_v47 = vadd.f32 %v2063_v34, %v591_v46  ;;  %v658_v48 = vmax.f32 %v600_v44, 0.0 }
 0x164   : > { %v1421_v49 = vpop.f32.mrf.mxu0 }
 0x165   : > { %v656_v51 = vmax.f32 %v592_v47, 0.0  ;;  %v678_v55 = vpack.c.bf16 %v658_v48, %v657_v52  ;;  %v613_v59 = vadd.f32 %v1421_v49, %v2063_v34 }
 0x166   : > { %v604_v53 = vpop.f32.mrf.mxu0 }
 0x167   : > { %v677_v54 = vpack.c.bf16 %v656_v51, %v655_v50  ;;  %v605_v57 = vadd.f32 %v2063_v34, %v604_v53  ;;  %v661_v2 = vmax.f32 %v613_v59, 0.0 }
 0x168   : > { %v1422_v56 = vpop.f32.mrf.mxu0 }
 0x169   : > { %v616_v58 = vadd.f32 %v1422_v56, %v2063_v34  ;;  %1463 = vmatprep.mubr.bf16.mxu1 %v677_v54  ;;  %v659_v0 = vmax.f32 %v605_v57, 0.0 }
 0x16a   : > { %v607_v60 = vpop.f32.mrf.mxu0  ;;  %1464 = vmatmul.mubr.bf16.gmra.mxu1 %v678_v55 }
 0x16b   : > { %v608_v61 = vadd.f32 %v2063_v34, %v607_v60  ;;  %v662_v62 = vmax.f32 %v616_v58, 0.0 }
 0x16c   : > { %v1425_v63 = vpop.f32.mrf.mxu0 }
 0x16d   : > { %v660_v1 = vmax.f32 %v608_v61, 0.0  ;;  %v680_v5 = vpack.c.bf16 %v662_v62, %v661_v2  ;;  %v629_v9 = vadd.f32 %v1425_v63, %v2063_v34 }
 0x16e   : > { %v620_v3 = vpop.f32.mrf.mxu0 }
 0x16f   : > { %v679_v4 = vpack.c.bf16 %v660_v1, %v659_v0  ;;  %v621_v7 = vadd.f32 %v2063_v34, %v620_v3  ;;  %v665_v15 = vmax.f32 %v629_v9, 0.0 }
 0x170   : > { %v1426_v6 = vpop.f32.mrf.mxu0 }
 0x171   : > { %v632_v8 = vadd.f32 %v1426_v6, %v2063_v34  ;;  %1467 = vmatprep.mubr.bf16.mxu1 %v679_v4  ;;  %v663_v13 = vmax.f32 %v621_v7, 0.0 }
 0x172   : > { %v623_v10 = vpop.f32.mrf.mxu0  ;;  %1468 = vmatmul.mubr.bf16.gmra.mxu1 %v680_v5 }
 0x173   : > { %v624_v11 = vadd.f32 %v2063_v34, %v623_v10  ;;  %v666_v12 = vmax.f32 %v632_v8, 0.0 }
 0x175   : > { %v664_v14 = vmax.f32 %v624_v11, 0.0  ;;  %v682_v17 = vpack.c.bf16 %v666_v12, %v665_v15 }
 0x177   : > { %v681_v16 = vpack.c.bf16 %v664_v14, %v663_v13 }
 0x179   : > { %1471 = vmatprep.mubr.bf16.mxu1 %v681_v16 }
 0x17a   : > { %1472 = vmatmul.mubr.bf16.gmra.mxu1 %v682_v17 }
 0x202   : > { %v1445_v19 = vpop.f32.mrf.mxu1 }
 0x203   : > { %v797_v20 = vadd.f32 %v1445_v19, %v2100_v18 }
 0x204   : > { %v788_v21 = vpop.f32.mrf.mxu1 }
 0x205   : > { %v1294_v22 = vmul.f32 -1.442695, %v797_v20  ;;  %v789_v34 = vadd.f32 %v2100_v18, %v788_v21 }
 0x206   : > { %v1446_v23 = vpop.f32.mrf.mxu1 }
 0x207   : > { %1578 = vpow2.f32 %v1294_v22  ;;  %v1292_v24 = vmul.f32 -1.442695, %v789_v34  ;;  %v800_v25 = vadd.f32 %v1446_v23, %v2100_v18 }
 0x208   : > { %v791_v26 = vpop.f32.mrf.mxu1 }
 0x209   : > { %1580 = vpow2.f32 %v1292_v24  ;;  %v1295_v27 = vmul.f32 -1.442695, %v800_v25  ;;  %v792_v28 = vadd.f32 %v2100_v18, %v791_v26 }
 0x20a   : > { %v1449_v29 = vpop.f32.mrf.mxu1 }
 0x20b   : > { %1582 = vpow2.f32 %v1295_v27  ;;  %v1293_v30 = vmul.f32 -1.442695, %v792_v28  ;;  %v813_v31 = vadd.f32 %v1449_v29, %v2100_v18 }
 0x20c   : > { %v804_v32 = vpop.f32.mrf.mxu1 }
 0x20d   : > { %1584 = vpow2.f32 %v1293_v30  ;;  %v1298_v33 = vmul.f32 -1.442695, %v813_v31  ;;  %v805_v35 = vadd.f32 %v2100_v18, %v804_v32 }
 0x20e   : > { %v1450_v36 = vpop.f32.mrf.mxu1 }
 0x20f   : > { %1586 = vpow2.f32 %v1298_v33  ;;  %v1296_v37 = vmul.f32 -1.442695, %v805_v35  ;;  %v816_v38 = vadd.f32 %v1450_v36, %v2100_v18 }
 0x210   : > { %v807_v39 = vpop.f32.mrf.mxu1 }
 0x211   : > { %1588 = vpow2.f32 %v1296_v37  ;;  %v1299_v40 = vmul.f32 -1.442695, %v816_v38  ;;  %v808_v41 = vadd.f32 %v2100_v18, %v807_v39 }
 0x212   : > { %v1453_v42 = vpop.f32.mrf.mxu1 }
 0x213   : > { %1590 = vpow2.f32 %v1299_v40  ;;  %v1297_v43 = vmul.f32 -1.442695, %v808_v41  ;;  %v829_v44 = vadd.f32 %v1453_v42, %v2100_v18 }
 0x214   : > { %v1579_v45 = vpop.eup %1578  ;;  %v820_v46 = vpop.f32.mrf.mxu1 }
 0x215   : > { %v1013_v47 = vadd.f32 1.0, %v1579_v45  ;;  %1592 = vpow2.f32 %v1297_v43  ;;  %v1302_v48 = vmul.f32 -1.442695, %v829_v44  ;;  %v821_v49 = vadd.f32 %v2100_v18, %v820_v46 }
 0x216   : > { %v1581_v50 = vpop.eup %1580  ;;  %v1454_v51 = vpop.f32.mrf.mxu1 }
 0x217   : > { %1594 = vrcp.f32 %v1013_v47  ;;  %v1011_v52 = vadd.f32 1.0, %v1581_v50  ;;  %v1300_v53 = vmul.f32 -1.442695, %v821_v49  ;;  %v832_v54 = vadd.f32 %v1454_v51, %v2100_v18 }
 0x218   : > { %v1583_v55 = vpop.eup %1582  ;;  %1596 = vpow2.f32 %v1302_v48  ;;  %v823_v56 = vpop.f32.mrf.mxu1 }
 0x219   : > { %1598 = vrcp.f32 %v1011_v52  ;;  %v1014_v57 = vadd.f32 1.0, %v1583_v55  ;;  %v1303_v58 = vmul.f32 -1.442695, %v832_v54  ;;  %v824_v59 = vadd.f32 %v2100_v18, %v823_v56 }
 0x21a   : > { %v1585_v60 = vpop.eup %1584  ;;  %1600 = vpow2.f32 %v1300_v53  ;;  %v1457_v61 = vpop.f32.mrf.mxu1 }
 0x21b   : > { %1602 = vrcp.f32 %v1014_v57  ;;  %v1012_v62 = vadd.f32 1.0, %v1585_v60  ;;  %v1301_v63 = vmul.f32 -1.442695, %v824_v59  ;;  %v845_v0 = vadd.f32 %v1457_v61, %v2100_v18 }
 0x21c   : > { %v1587_v1 = vpop.eup %1586  ;;  %1604 = vpow2.f32 %v1303_v58  ;;  %v836_v2 = vpop.f32.mrf.mxu1 }
 0x21d   : > { %1606 = vrcp.f32 %v1012_v62  ;;  %v1017_v3 = vadd.f32 1.0, %v1587_v1  ;;  %v1306_v4 = vmul.f32 -1.442695, %v845_v0  ;;  %v837_v5 = vadd.f32 %v2100_v18, %v836_v2 }
 0x21e   : > { %v1589_v6 = vpop.eup %1588  ;;  %1608 = vpow2.f32 %v1301_v63  ;;  %v1458_v7 = vpop.f32.mrf.mxu1 }
 0x21f   : > { %1610 = vrcp.f32 %v1017_v3  ;;  %v1015_v8 = vadd.f32 1.0, %v1589_v6  ;;  %v1304_v9 = vmul.f32 -1.442695, %v837_v5  ;;  %v848_v10 = vadd.f32 %v1458_v7, %v2100_v18 }
 0x220   : > { %v1591_v11 = vpop.eup %1590  ;;  %1612 = vpow2.f32 %v1306_v4  ;;  %v839_v12 = vpop.f32.mrf.mxu1 }
 0x221   : > { %1614 = vrcp.f32 %v1015_v8  ;;  %v1018_v13 = vadd.f32 1.0, %v1591_v11  ;;  %v1307_v14 = vmul.f32 -1.442695, %v848_v10  ;;  %v840_v15 = vadd.f32 %v2100_v18, %v839_v12 }
 0x222   : > { %v1593_v16 = vpop.eup %1592  ;;  %1616 = vpow2.f32 %v1304_v9  ;;  %v1461_v17 = vpop.f32.mrf.mxu1 }
 0x223   : > { %1618 = vrcp.f32 %v1018_v13  ;;  %v1016_v19 = vadd.f32 1.0, %v1593_v16  ;;  %v1305_v20 = vmul.f32 -1.442695, %v840_v15  ;;  %v861_v21 = vadd.f32 %v1461_v17, %v2100_v18 }
 0x224   : > { %v1595_v22 = vpop.eup %1594  ;;  %1620 = vpow2.f32 %v1307_v14  ;;  %v852_v34 = vpop.f32.mrf.mxu1 }
 0x225   : > { %v1597_v23 = vpop.eup %1596  ;;  %1109 = vst [vmem:[%s2120_s13 + $0x10] sm:$0xff] %v1595_v22  ;;  %1622 = vrcp.f32 %v1016_v19  ;;  %v1310_v24 = vmul.f32 -1.442695, %v861_v21  ;;  %v853_v25 = vadd.f32 %v2100_v18, %v852_v34 }
 0x226   : > { %v1599_v26 = vpop.eup %1598  ;;  %v1021_v27 = vadd.f32 1.0, %v1597_v23  ;;  %1624 = vpow2.f32 %v1305_v20  ;;  %v1462_v28 = vpop.f32.mrf.mxu1 }
 0x227   : > { %v1601_v29 = vpop.eup %1600  ;;  %1107 = vst [vmem:[%s2120_s13] sm:$0xff] %v1599_v26  ;;  %1626 = vpow2.f32 %v1310_v24  ;;  %v1308_v30 = vmul.f32 -1.442695, %v853_v25  ;;  %v864_v31 = vadd.f32 %v1462_v28, %v2100_v18 }
 0x228   : > { %v1603_v32 = vpop.eup %1602  ;;  %1628 = vrcp.f32 %v1021_v27  ;;  %v1019_v33 = vadd.f32 1.0, %v1601_v29  ;;  %v855_v35 = vpop.f32.mrf.mxu1 }
 0x229   : > { %v1605_v36 = vpop.eup %1604  ;;  %1110 = vst [vmem:[%s2120_s13 + $0x18] sm:$0xff] %v1603_v32  ;;  %1630 = vpow2.f32 %v1308_v30  ;;  %v1311_v37 = vmul.f32 -1.442695, %v864_v31  ;;  %v856_v38 = vadd.f32 %v2100_v18, %v855_v35 }
 0x22a   : > { %v1607_v39 = vpop.eup %1606  ;;  %1632 = vrcp.f32 %v1019_v33  ;;  %v1022_v40 = vadd.f32 1.0, %v1605_v36  ;;  %v1465_v41 = vpop.f32.mrf.mxu1 }
 0x22b   : > { %v1609_v42 = vpop.eup %1608  ;;  %1108 = vst [vmem:[%s2120_s13 + $0x8] sm:$0xff] %v1607_v39  ;;  %1634 = vpow2.f32 %v1311_v37  ;;  %v1309_v43 = vmul.f32 -1.442695, %v856_v38  ;;  %v877_v44 = vadd.f32 %v1465_v41, %v2100_v18 }
 0x22c   : > { %v1611_v45 = vpop.eup %1610  ;;  %1636 = vrcp.f32 %v1022_v40  ;;  %v1020_v46 = vadd.f32 1.0, %v1609_v42  ;;  %v868_v47 = vpop.f32.mrf.mxu1 }
 0x22d   : > { %v1613_v48 = vpop.eup %1612  ;;  %1113 = vst [vmem:[%s2120_s13 + $0x30] sm:$0xff] %v1611_v45  ;;  %1638 = vpow2.f32 %v1309_v43  ;;  %v1314_v49 = vmul.f32 -1.442695, %v877_v44  ;;  %v869_v50 = vadd.f32 %v2100_v18, %v868_v47 }
 0x22e   : > { %v1615_v51 = vpop.eup %1614  ;;  %1640 = vrcp.f32 %v1020_v46  ;;  %v1025_v52 = vadd.f32 1.0, %v1613_v48  ;;  %v1466_v53 = vpop.f32.mrf.mxu1 }
 0x22f   : > { %v1617_v54 = vpop.eup %1616  ;;  %1111 = vst [vmem:[%s2120_s13 + $0x20] sm:$0xff] %v1615_v51  ;;  %1642 = vpow2.f32 %v1314_v49  ;;  %v1312_v55 = vmul.f32 -1.442695, %v869_v50  ;;  %v880_v56 = vadd.f32 %v1466_v53, %v2100_v18 }
 0x230   : > { %v1619_v57 = vpop.eup %1618  ;;  %1644 = vrcp.f32 %v1025_v52  ;;  %v1023_v58 = vadd.f32 1.0, %v1617_v54  ;;  %v871_v59 = vpop.f32.mrf.mxu1 }
 0x231   : > { %v1621_v60 = vpop.eup %1620  ;;  %1114 = vst [vmem:[%s2120_s13 + $0x38] sm:$0xff] %v1619_v57  ;;  %1646 = vpow2.f32 %v1312_v55  ;;  %v1315_v61 = vmul.f32 -1.442695, %v880_v56  ;;  %v872_v62 = vadd.f32 %v2100_v18, %v871_v59 }
 0x232   : > { %v1623_v63 = vpop.eup %1622  ;;  %1648 = vrcp.f32 %v1023_v58  ;;  %v1026_v0 = vadd.f32 1.0, %v1621_v60  ;;  %v1469_v1 = vpop.f32.mrf.mxu1 }
 0x233   : > { %v1625_v2 = vpop.eup %1624  ;;  %1112 = vst [vmem:[%s2120_s13 + $0x28] sm:$0xff] %v1623_v63  ;;  %1650 = vpow2.f32 %v1315_v61  ;;  %v1313_v3 = vmul.f32 -1.442695, %v872_v62  ;;  %v893_v4 = vadd.f32 %v1469_v1, %v2100_v18 }
 0x234   : > { %v1627_v5 = vpop.eup %1626  ;;  %1652 = vrcp.f32 %v1026_v0  ;;  %v1024_v6 = vadd.f32 1.0, %v1625_v2  ;;  %v884_v7 = vpop.f32.mrf.mxu1 }
 0x235   : > { %v1629_v8 = vpop.eup %1628  ;;  %v1029_v9 = vadd.f32 1.0, %v1627_v5  ;;  %1654 = vpow2.f32 %v1313_v3  ;;  %v1318_v10 = vmul.f32 -1.442695, %v893_v4  ;;  %v885_v11 = vadd.f32 %v2100_v18, %v884_v7 }
 0x236   : > { %v1631_v12 = vpop.eup %1630  ;;  %1117 = vst [vmem:[%s2120_s13 + $0x50] sm:$0xff] %v1629_v8  ;;  %1656 = vrcp.f32 %v1024_v6  ;;  %v1470_v13 = vpop.f32.mrf.mxu1 }
 0x237   : > { %v1633_v14 = vpop.eup %1632  ;;  %1658 = vrcp.f32 %v1029_v9  ;;  %v1027_v15 = vadd.f32 1.0, %v1631_v12  ;;  %v1316_v16 = vmul.f32 -1.442695, %v885_v11  ;;  %v896_v17 = vadd.f32 %v1470_v13, %v2100_v18 }
 0x238   : > { %v1635_v19 = vpop.eup %1634  ;;  %1115 = vst [vmem:[%s2120_s13 + $0x40] sm:$0xff] %v1633_v14  ;;  %1660 = vpow2.f32 %v1318_v10  ;;  %v887_v20 = vpop.f32.mrf.mxu1 }
 0x239   : > { %v1637_v21 = vpop.eup %1636  ;;  %1662 = vrcp.f32 %v1027_v15  ;;  %v1030_v22 = vadd.f32 1.0, %v1635_v19  ;;  %v1319_v34 = vmul.f32 -1.442695, %v896_v17  ;;  %v888_v23 = vadd.f32 %v2100_v18, %v887_v20 }
 0x23a   : > { %v1639_v24 = vpop.eup %1638  ;;  %1118 = vst [vmem:[%s2120_s13 + $0x58] sm:$0xff] %v1637_v21  ;;  %1664 = vpow2.f32 %v1316_v16  ;;  %v1473_v25 = vpop.f32.mrf.mxu1 }
 0x23b   : > { %v1641_v26 = vpop.eup %1640  ;;  %1666 = vrcp.f32 %v1030_v22  ;;  %v1028_v27 = vadd.f32 1.0, %v1639_v24  ;;  %v1317_v28 = vmul.f32 -1.442695, %v888_v23  ;;  %v909_v29 = vadd.f32 %v1473_v25, %v2100_v18 }
 0x23c   : > { %v1643_v30 = vpop.eup %1642  ;;  %1116 = vst [vmem:[%s2120_s13 + $0x48] sm:$0xff] %v1641_v26  ;;  %1668 = vpow2.f32 %v1319_v34  ;;  %v900_v31 = vpop.f32.mrf.mxu1 }
 0x23d   : > { %v1645_v32 = vpop.eup %1644  ;;  %1670 = vrcp.f32 %v1028_v27  ;;  %v1033_v33 = vadd.f32 1.0, %v1643_v30  ;;  %v1322_v35 = vmul.f32 -1.442695, %v909_v29  ;;  %v901_v36 = vadd.f32 %v2100_v18, %v900_v31 }
 0x23e   : > { %v1647_v37 = vpop.eup %1646  ;;  %1121 = vst [vmem:[%s2120_s13 + $0x70] sm:$0xff] %v1645_v32  ;;  %1672 = vpow2.f32 %v1317_v28  ;;  %v1474_v38 = vpop.f32.mrf.mxu1 }
 0x23f   : > { %v1649_v39 = vpop.eup %1648  ;;  %1674 = vrcp.f32 %v1033_v33  ;;  %v1031_v40 = vadd.f32 1.0, %v1647_v37  ;;  %v1320_v41 = vmul.f32 -1.442695, %v901_v36  ;;  %v912_v42 = vadd.f32 %v1474_v38, %v2100_v18 }
 0x240   : > { %v1651_v43 = vpop.eup %1650  ;;  %1119 = vst [vmem:[%s2120_s13 + $0x60] sm:$0xff] %v1649_v39  ;;  %1676 = vpow2.f32 %v1322_v35  ;;  %v903_v44 = vpop.f32.mrf.mxu1 }
 0x241   : > { %v1653_v45 = vpop.eup %1652  ;;  %1678 = vrcp.f32 %v1031_v40  ;;  %v1034_v46 = vadd.f32 1.0, %v1651_v43  ;;  %v1323_v47 = vmul.f32 -1.442695, %v912_v42  ;;  %v904_v48 = vadd.f32 %v2100_v18, %v903_v44 }
 0x242   : > { %v1655_v49 = vpop.eup %1654  ;;  %1122 = vst [vmem:[%s2120_s13 + $0x78] sm:$0xff] %v1653_v45  ;;  %1680 = vpow2.f32 %v1320_v41 }
 0x243   : > { %v1657_v50 = vpop.eup %1656  ;;  %1682 = vrcp.f32 %v1034_v46  ;;  %v1032_v51 = vadd.f32 1.0, %v1655_v49  ;;  %v1321_v52 = vmul.f32 -1.442695, %v904_v48 }
 0x244   : > { %v1659_v53 = vpop.eup %1658  ;;  %1120 = vst [vmem:[%s2120_s13 + $0x68] sm:$0xff] %v1657_v50  ;;  %1684 = vpow2.f32 %v1323_v47 }
 0x245   : > { %v1661_v54 = vpop.eup %1660  ;;  %1125 = vst [vmem:[%s2120_s13 + $0x90] sm:$0xff] %v1659_v53  ;;  %1686 = vrcp.f32 %v1032_v51 }
 0x246   : > { %v1663_v55 = vpop.eup %1662  ;;  %v1037_v56 = vadd.f32 1.0, %v1661_v54  ;;  %1688 = vpow2.f32 %v1321_v52 }
 0x247   : > { %v1665_v18 = vpop.eup %1664  ;;  %1123 = vst [vmem:[%s2120_s13 + $0x80] sm:$0xff] %v1663_v55 }
 0x248   : > { %v1667_v57 = vpop.eup %1666  ;;  %1690 = vrcp.f32 %v1037_v56  ;;  %v1035_v58 = vadd.f32 1.0, %v1665_v18 }
 0x249   : > { %v1669_v59 = vpop.eup %1668  ;;  %1126 = vst [vmem:[%s2120_s13 + $0x98] sm:$0xff] %v1667_v57 }
 0x24a   : > { %v1671_v60 = vpop.eup %1670  ;;  %1692 = vrcp.f32 %v1035_v58  ;;  %v1038_v61 = vadd.f32 1.0, %v1669_v59 }
 0x24b   : > { %v1673_v62 = vpop.eup %1672  ;;  %1124 = vst [vmem:[%s2120_s13 + $0x88] sm:$0xff] %v1671_v60 }
 0x24c   : > { %v1675_v63 = vpop.eup %1674  ;;  %1694 = vrcp.f32 %v1038_v61  ;;  %v1036_v0 = vadd.f32 1.0, %v1673_v62 }
 0x24d   : > { %v1677_v1 = vpop.eup %1676  ;;  %1129 = vst [vmem:[%s2120_s13 + $0xb0] sm:$0xff] %v1675_v63 }
 0x24e   : > { %v1679_v2 = vpop.eup %1678  ;;  %1696 = vrcp.f32 %v1036_v0  ;;  %v1041_v3 = vadd.f32 1.0, %v1677_v1 }
 0x24f   : > { %v1681_v4 = vpop.eup %1680  ;;  %1127 = vst [vmem:[%s2120_s13 + $0xa0] sm:$0xff] %v1679_v2 }
 0x250   : > { %v1683_v5 = vpop.eup %1682  ;;  %1698 = vrcp.f32 %v1041_v3  ;;  %v1039_v6 = vadd.f32 1.0, %v1681_v4 }
 0x251   : > { %v1685_v7 = vpop.eup %1684  ;;  %1130 = vst [vmem:[%s2120_s13 + $0xb8] sm:$0xff] %v1683_v5 }
 0x252   : > { %v1687_v8 = vpop.eup %1686  ;;  %1700 = vrcp.f32 %v1039_v6  ;;  %v1042_v9 = vadd.f32 1.0, %v1685_v7 }
 0x253   : > { %v1689_v10 = vpop.eup %1688  ;;  %1128 = vst [vmem:[%s2120_s13 + $0xa8] sm:$0xff] %v1687_v8 }
 0x254   : > { %1702 = vrcp.f32 %v1042_v9  ;;  %v1040_v11 = vadd.f32 1.0, %v1689_v10 }
 0x255   : > { %v1691_v12 = vpop.eup %1690 }
 0x256   : > { %1133 = vst [vmem:[%s2120_s13 + $0xd0] sm:$0xff] %v1691_v12  ;;  %1704 = vrcp.f32 %v1040_v11 }
 0x257   : > { %v1693_v13 = vpop.eup %1692 }
 0x258   : > { %1131 = vst [vmem:[%s2120_s13 + $0xc0] sm:$0xff] %v1693_v13 }
 0x259   : > { %v1695_v14 = vpop.eup %1694 }
 0x25a   : > { %1134 = vst [vmem:[%s2120_s13 + $0xd8] sm:$0xff] %v1695_v14 }
 0x25b   : > { %v1697_v15 = vpop.eup %1696 }
 0x25c   : > { %1132 = vst [vmem:[%s2120_s13 + $0xc8] sm:$0xff] %v1697_v15 }
 0x25d   : > { %v1699_v16 = vpop.eup %1698 }
 0x25e   : > { %1137 = vst [vmem:[%s2120_s13 + $0xf0] sm:$0xff] %v1699_v16 }
 0x25f   : > { %v1701_v17 = vpop.eup %1700 }
 0x260   : > { %1135 = vst [vmem:[%s2120_s13 + $0xe0] sm:$0xff] %v1701_v17 }
 0x261   : > { %v1703_v19 = vpop.eup %1702 }
 0x262   : > { %1138 = vst [vmem:[%s2120_s13 + $0xf8] sm:$0xff] %v1703_v19 }
 0x263   : > { %v1705_v20 = vpop.eup %1704 }
 0x264   : > { %1136 = vst [vmem:[%s2120_s13 + $0xe8] sm:$0xff] %v1705_v20 }
 0x265   : > { %1799 = shalt.err (!%p1796_p3)
}
 0x266   : > { %s1800_s24 = scalar_lea.hbm %s2172_s17, 4096  ;;  %s1804_s10 = scalar_lea.hbm %s2224_s5, 8192 }
 0x267   : > { %p1801_p11 = scmp.ne.s32.totalorder %s2172_s17, %s1800_s24  ;;  %p1805_p4 = scmp.lt.s32.totalorder %s2172_s17, %s2224_s5 }
 0x268   : > { %p1806_p6 = scmp.lt.s32.totalorder %s1804_s10, %s1800_s24 }
 0x269   : > { %p1802_p9 = pnand %p1801_p11, %p2241_p2 }
 0x26a   : > { %p1807_p8 = por %p1806_p6, %p1805_p4 }
 0x26b   : > { %p1803_p1 = pneg %p1802_p9 }
 0x26d   : > { %p1808_p5 = pnand %p1807_p8, %p1803_p1 }
 0x26f   : > { %1811 = shalt.err (!%p1808_p5)
}
 0x270   : > { %s1862_s14 = smov 128   ;;  %s1863_s28 = smov 8  }
 0x271   : > { %1485 = dma.vmem_to_hbm [thread:$0]  (%p2241_p2), %s2174_s7, 4096, %s2172_s17, %s1140_s16, %s1862_s14, %s1862_s14, %s1863_s28  }
 0x272 PF: > { %s1168_s11 = sand.u32 1, %s1842_s18   ;;  %p2242_p7 = scmp.ne.s32.totalorder %s2231_s25, 0 }
 0x273   : > { %p2243_p12 = scmp.ge.s32.totalorder %s1854_s21, 2  ;;  %s1169_s8 = scalar_lea.sflag [#allocation4], %s1168_s11 }
 0x275   : > { %p1499_p13 = pnand %p2243_p12, %p2242_p7 }
 0x277   : > { %p1500_p0 = pneg %p1499_p13 }
 0x279   : > { %1837 = dma.done.wait (%p1500_p0), %s1169_s8, 4096  }
 0x27a   : > { %1839 = vsyncadd (%p1500_p0), %s1169_s8, 4294963200  ;;  %p19_p10 = scmp.ge.s32.totalorder %s1972_s15, 4   ;;  %s2244_s18 = smov %s1846_s19 }
 0x27b   : > { %s2245_s19 = smov %s1850_s20  ;;  %s2246_s20 = smov %s1988_s27 }
 0x27c   : > { %s2247_s21 = smov %s1972_s15  ;;  %21 = sbr.rel (!%p19_p10) target bundleno = 6 (0x6), region = 93 }
 0x281   :  { %1174 = vsyncpa [#allocation3], 1 }
 0x282   :  { %1176 = vsyncpa [#allocation3 + $0x1], 1 }
 0x283   :  { %1177 = vsyncpa [#allocation6], 1 }
 0x284   :  { %1178 = vsyncpa [#allocation4], 1 }
 0x285   :  { %1180 = vsyncpa [#allocation4 + $0x1], 1 }

</bundles_post_ra>
